<compile_context>
chip_gen: v7x
topology: tpu7x:2x2x1
jax: 0.10.0
libtpu: 0.0.40
codegen_flags: <defaults>
</compile_context>

<pallas_src>
import jax
import jax.numpy as jnp
from jax import lax
from jax.experimental import pallas as pl
from jax.experimental.pallas import tpu as pltpu


# ----------------------------- Pallas kernel ------------------------------ #
def fused_grace_kernel(a_ref, x_ref, w1_ref, b1_ref, w2_ref, b2_ref, o_ref,
                       pw_ref, h1_ref, acc_ref):
    """Two fused GCN layers.

    grid = (layer, i, k):
      layer 0: H1 = relu(A @ (X  @ W1) + b1)   (H1 kept in VMEM scratch)
      layer 1: Z  = relu(A @ (H1 @ W2) + b2)
    a_ref  : (tm, tk)   bf16 tile of A_norm                 (indexed by i, k)
    x_ref  : (N, Fin)   bf16, resident full block
    w*/b*  : resident full blocks (bf16 / f32)
    o_ref  : (tm, P)    f32 output tile                      (indexed by i)
    pw_ref : (N, P)     bf16 scratch — current layer's X@W / H1@W2
    h1_ref : (N, P)     bf16 scratch — layer-1 activations
    acc_ref: (tm, P)    f32 accumulator
    """
    layer = pl.program_id(0)
    i = pl.program_id(1)
    k = pl.program_id(2)
    nk = pl.num_programs(2)

    tm = o_ref.shape[0]
    tk = a_ref.shape[1]
    k_off = pl.multiple_of(k * tk, tk)
    i_off = pl.multiple_of(i * tm, tm)

    # Zero the accumulator at the start of each K reduction.
    @pl.when(k == 0)
    def _init_acc():
        acc_ref[...] = jnp.zeros_like(acc_ref)

    # Compute this layer's projected features for K-tile k exactly once
    # (on the first row block) and cache them in VMEM.
    @pl.when(i == 0)
    def _project():
        @pl.when(layer == 0)
        def _():
            pw_ref[pl.ds(k_off, tk), :] = jnp.dot(
                x_ref[pl.ds(k_off, tk), :], w1_ref[...],
                preferred_element_type=jnp.float32).astype(pw_ref.dtype)

        @pl.when(layer == 1)
        def _():
            pw_ref[pl.ds(k_off, tk), :] = jnp.dot(
                h1_ref[pl.ds(k_off, tk), :], w2_ref[...],
                preferred_element_type=jnp.float32).astype(pw_ref.dtype)

    # MXU accumulate: A[i, k] @ PW[k]  (bf16 x bf16 -> f32 accumulation)
    acc_ref[...] += jnp.dot(a_ref[...], pw_ref[pl.ds(k_off, tk), :],
                            preferred_element_type=jnp.float32)

    # Epilogue once per row block: bias + ReLU.
    @pl.when(k == nk - 1)
    def _finalize():
        @pl.when(layer == 0)
        def _():
            h = jnp.maximum(acc_ref[...] + b1_ref[...], 0.0)
            h1_ref[pl.ds(i_off, tm), :] = h.astype(h1_ref.dtype)
            o_ref[...] = h.astype(o_ref.dtype)   # overwritten by layer 1

        @pl.when(layer == 1)
        def _():
            o_ref[...] = jnp.maximum(acc_ref[...] + b2_ref[...],
                                     0.0).astype(o_ref.dtype)


# ------------------------------ host wrapper ------------------------------- #
def _round_up(a, m):
    return (a + m - 1) // m * m


def _pick_tile(n_pad, cap):
    """Largest multiple of 128 <= cap that divides n_pad (n_pad % 128 == 0)."""
    t = min(cap, n_pad)
    t -= t % 128
    while n_pad % t:
        t -= 128
    return t


def grace_encoder_forward(x, a_norm, params):
    """relu(A@(relu(A@(X@W1)+b1)@W2)+b2) via one fused, tiled Pallas call."""
    (w1, b1), (w2, b2) = params
    n, f_in = x.shape
    hid = w1.shape[1]
    out_c = w2.shape[1]

    # Lane-dense padded widths (>= 128).
    P = _round_up(max(hid, out_c, 128), 128)
    f_in_pad = _round_up(max(f_in, 128), 128)
    n_pad = _round_up(n, 128)

    # Tile sizes: modest caps keep double-buffered A tiles tiny vs. VMEM
    # (256*512 bf16 = 256 KiB per buffer) -> safe on v5e/v6e/v7x.
    tm = _pick_tile(n_pad, 256)
    tk = _pick_tile(n_pad, 512)
    grid = (2, n_pad // tm, n_pad // tk)

    # Pad + cast the big operands to bf16 (f32 accumulation inside the kernel).
    a_p = jnp.zeros((n_pad, n_pad), jnp.bfloat16).at[:n, :n].set(
        a_norm.astype(jnp.bfloat16))
    x_p = jnp.zeros((n_pad, f_in_pad), jnp.bfloat16).at[:n, :f_in].set(
        x.astype(jnp.bfloat16))
    w1_p = jnp.zeros((f_in_pad, P), jnp.bfloat16).at[:f_in, :hid].set(
        w1.astype(jnp.bfloat16))
    b1_p = jnp.zeros((1, P), jnp.float32).at[0, :hid].set(b1)
    w2_p = jnp.zeros((P, P), jnp.bfloat16).at[:hid, :out_c].set(
        w2.astype(jnp.bfloat16))
    b2_p = jnp.zeros((1, P), jnp.float32).at[0, :out_c].set(b2)

    flops = int(2 * n_pad * f_in_pad * P        # X @ W1
                + 2 * n_pad * P * P             # H1 @ W2
                + 4 * n_pad * n_pad * P)        # two A @ (.) passes
    bytes_accessed = int(2 * n_pad * n_pad * 2          # A streamed per layer
                         + n_pad * f_in_pad * 2
                         + f_in_pad * P * 2 + P * P * 2
                         + n_pad * P * 4)

    out = pl.pallas_call(
        fused_grace_kernel,
        out_shape=jax.ShapeDtypeStruct((n_pad, P), jnp.float32),
        grid_spec=pltpu.PrefetchScalarGridSpec(
            num_scalar_prefetch=0,
            grid=grid,
            in_specs=[
                pl.BlockSpec((tm, tk), lambda l, i, k: (i, k)),          # A
                pl.BlockSpec((n_pad, f_in_pad), lambda l, i, k: (0, 0)),  # X
                pl.BlockSpec((f_in_pad, P), lambda l, i, k: (0, 0)),      # W1
                pl.BlockSpec((1, P), lambda l, i, k: (0, 0)),             # b1
                pl.BlockSpec((P, P), lambda l, i, k: (0, 0)),             # W2
                pl.BlockSpec((1, P), lambda l, i, k: (0, 0)),             # b2
            ],
            out_specs=pl.BlockSpec((tm, P), lambda l, i, k: (i, 0)),
            scratch_shapes=[
                pltpu.VMEM((n_pad, P), jnp.bfloat16),   # pw  (X@W1 / H1@W2)
                pltpu.VMEM((n_pad, P), jnp.bfloat16),   # h1  (layer-1 acts)
                pltpu.VMEM((tm, P), jnp.float32),       # acc
            ],
        ),
        compiler_params=pltpu.CompilerParams(
            # Layer-1 rows depend on ALL layer-0 rows (h1 scratch), so every
            # axis must run sequentially on one core.
            dimension_semantics=("arbitrary", "arbitrary", "arbitrary")),
        cost_estimate=pl.CostEstimate(flops=flops, transcendentals=0,
                                      bytes_accessed=bytes_accessed),
    )(a_p, x_p, w1_p, b1_p, w2_p, b2_p)

    return out[:n, :out_c]


# ------------------------------- glue (JAX) -------------------------------- #
def build_normalized_adjacency(edge_index, num_nodes):
    """Dense symmetric-normalized adjacency with self-loops (GCNConv norm).

    Binary adjacency (duplicate edges de-duplicated); isolated-node degrees
    guarded (inf -> 0), matching PyG behaviour.
    """
    src, dst = edge_index[0], edge_index[1]
    a = jnp.zeros((num_nodes, num_nodes), jnp.float32)
    a = a.at[dst, src].set(1.0)                       # message src -> dst
    diag = jnp.arange(num_nodes)
    a = a.at[diag, diag].set(1.0)                     # add self-loops
    deg = a.sum(axis=1)
    deg_safe = jnp.where(deg > 0, deg, 1.0)
    d_inv_sqrt = jnp.where(deg > 0, 1.0 / jnp.sqrt(deg_safe), 0.0)
    return a * d_inv_sqrt[:, None] * d_inv_sqrt[None, :]


def init_params(key, in_channels, out_channels):
    """Deterministic Glorot-style init for the two GCN layers (k=2)."""
    k1, k2, k3, k4 = jax.random.split(key, 4)
    hid = 2 * out_channels

    def glorot(k, fan_in, fan_out):
        lim = jnp.sqrt(6.0 / (fan_in + fan_out))
        return jax.random.uniform(k, (fan_in, fan_out), jnp.float32, -lim, lim)

    w1 = glorot(k1, in_channels, hid)
    b1 = jax.random.uniform(k2, (hid,), jnp.float32, -0.1, 0.1)
    w2 = glorot(k3, hid, out_channels)
    b2 = jax.random.uniform(k4, (out_channels,), jnp.float32, -0.1, 0.1)
    return (w1, b1), (w2, b2)


def model_forward(x, a_norm, params):
    """Equivalent of Model.forward(x, edge_index) with A_norm pre-built/cached."""
    return grace_encoder_forward(x, a_norm, params)


# --------------------------------- driver ---------------------------------- #
if __name__ == "__main__":
    key = jax.random.PRNGKey(0)
    kx, kp = jax.random.split(key, 2)

    num_nodes = 8
    in_channels = 32
    out_channels = 16  # hidden layer width = 2 * out_channels = 32

    # node features [N, F_in]
    x = jax.random.normal(kx, (num_nodes, in_channels), jnp.float32)

    # deterministic small graph: ring + a few chords, as edge_index [2, E]
    src = jnp.array([0, 1, 2, 3, 4, 5, 6, 7, 0, 2, 4, 1], dtype=jnp.int32)
    dst = jnp.array([1, 2, 3, 4, 5, 6, 7, 0, 4, 6, 0, 5], dtype=jnp.int32)
    edge_index = jnp.stack([jnp.concatenate([src, dst]),
                            jnp.concatenate([dst, src])])  # undirected

    params = init_params(kp, in_channels, out_channels)

    # A_norm depends only on the (static) graph: build once, reuse every call.
    a_norm = build_normalized_adjacency(edge_index, num_nodes)

    fwd = jax.jit(model_forward)
    z = jax.block_until_ready(fwd(x, a_norm, params))

    assert z.shape == (num_nodes, out_channels), z.shape
    assert bool(jnp.all(jnp.isfinite(z)))

    # Pure-JAX f32 reference check (bf16 inputs in-kernel -> loose tolerance).
    (w1, b1), (w2, b2) = params
    h_ref = jnp.maximum(a_norm @ (x @ w1) + b1, 0.0)
    z_ref = jnp.maximum(a_norm @ (h_ref @ w2) + b2, 0.0)
    max_err = float(jnp.max(jnp.abs(z - z_ref)))
    assert max_err < 0.1, max_err

    # TODO(synk): Model.projection / Model.loss (fc1/fc2 + contrastive loss)
    # are not on the forward path and are intentionally not implemented.
    print("KERNEL_OK")
</pallas_src>

<mosaic_0001>
module attributes {stable_mosaic.version = 11 : i64} {
  func.func @fused_grace_kernel(%arg0: i32, %arg1: i32, %arg2: i32, %arg3: memref<128x128xbf16, #tpu.memory_space<vmem>>, %arg4: memref<128x128xbf16, #tpu.memory_space<vmem>>, %arg5: memref<128x128xbf16, #tpu.memory_space<vmem>>, %arg6: memref<1x128xf32, #tpu.memory_space<vmem>>, %arg7: memref<128x128xbf16, #tpu.memory_space<vmem>>, %arg8: memref<1x128xf32, #tpu.memory_space<vmem>>, %arg9: memref<128x128xf32, #tpu.memory_space<vmem>>, %arg10: memref<128x128xbf16, #tpu.memory_space<vmem>>, %arg11: memref<128x128xbf16, #tpu.memory_space<vmem>>, %arg12: memref<128x128xf32, #tpu.memory_space<vmem>>) attributes {dimension_semantics = [#tpu.dimension_semantics<arbitrary>, #tpu.dimension_semantics<arbitrary>, #tpu.dimension_semantics<arbitrary>], iteration_bounds = array<i64: 2, 1, 1>, scalar_prefetch = 0 : i64, scratch_operands = 3 : i64, tpu.core_type = #tpu.core_type<tc>, window_params = [{transform_indices = @transform_0, window_bounds = array<i64: 128, 128>}, {pipeline_mode = #tpu.pipeline_mode<synchronous>, transform_indices = @transform_1, window_bounds = array<i64: 128, 128>}, {pipeline_mode = #tpu.pipeline_mode<synchronous>, transform_indices = @transform_2, window_bounds = array<i64: 128, 128>}, {pipeline_mode = #tpu.pipeline_mode<synchronous>, transform_indices = @transform_3, window_bounds = array<i64: 1, 128>}, {pipeline_mode = #tpu.pipeline_mode<synchronous>, transform_indices = @transform_4, window_bounds = array<i64: 128, 128>}, {pipeline_mode = #tpu.pipeline_mode<synchronous>, transform_indices = @transform_5, window_bounds = array<i64: 1, 128>}, {transform_indices = @transform_6, window_bounds = array<i64: 128, 128>}]} {
    %c128_i32 = arith.constant 128 : i32
    %0 = arith.muli %arg2, %c128_i32 : i32
    %1 = tpu.assume_multiple %0, 128 : i32
    %c128_i32_0 = arith.constant 128 : i32
    %2 = arith.muli %arg1, %c128_i32_0 : i32
    %3 = tpu.assume_multiple %2, 128 : i32
    %c0_i32 = arith.constant 0 : i32
    %4 = arith.cmpi eq, %arg2, %c0_i32 : i32
    %5 = arith.extui %4 : i1 to i32
    %c0_i32_1 = arith.constant 0 : i32
    %6 = arith.cmpi ne, %5, %c0_i32_1 : i32
    scf.if %6 {
      %cst_12 = arith.constant 0.000000e+00 : f32
      %20 = vector.broadcast %cst_12 : f32 to vector<128x128xf32>
      %c0_13 = arith.constant 0 : index
      %c0_14 = arith.constant 0 : index
      %21 = vector.load %arg12[%c0_13, %c0_14] : memref<128x128xf32, #tpu.memory_space<vmem>>, vector<128x128xf32>
      tpu.vector_store %arg12[%c0_13, %c0_14], %20 {strides = array<i32>} : memref<128x128xf32, #tpu.memory_space<vmem>>, vector<128x128xf32>,
    } else {
    }
    %c0_i32_2 = arith.constant 0 : i32
    %7 = arith.cmpi eq, %arg1, %c0_i32_2 : i32
    %8 = arith.extui %7 : i1 to i32
    %c0_i32_3 = arith.constant 0 : i32
    %9 = arith.cmpi ne, %8, %c0_i32_3 : i32
    scf.if %9 {
      %c0_i32_12 = arith.constant 0 : i32
      %20 = arith.cmpi eq, %arg0, %c0_i32_12 : i32
      %21 = arith.extui %20 : i1 to i32
      %c0_i32_13 = arith.constant 0 : i32
      %22 = arith.cmpi ne, %21, %c0_i32_13 : i32
      scf.if %22 {
        %26 = arith.index_cast %1 : i32 to index
        %c0_15 = arith.constant 0 : index
        %27 = vector.load %arg4[%26, %c0_15] : memref<128x128xbf16, #tpu.memory_space<vmem>>, vector<128x128xbf16>
        %c0_16 = arith.constant 0 : index
        %c0_17 = arith.constant 0 : index
        %28 = vector.load %arg5[%c0_16, %c0_17] : memref<128x128xbf16, #tpu.memory_space<vmem>>, vector<128x128xbf16>
        %cst_18 = arith.constant dense<0.000000e+00> : vector<128x128xf32>
        %29 = tpu.matmul %27, %28, %cst_18 {dimension_numbers = #tpu.dot_dimension_numbers<[1], [0], [0], [1], [0, 0, 1, 1], [], []>} : vector<128x128xbf16>, vector<128x128xbf16>, vector<128x128xf32> -> vector<128x128xf32>
        %30 = arith.truncf %29 : vector<128x128xf32> to vector<128x128xbf16>
        %31 = arith.index_cast %1 : i32 to index
        %c0_19 = arith.constant 0 : index
        %32 = vector.load %arg10[%31, %c0_19] : memref<128x128xbf16, #tpu.memory_space<vmem>>, vector<128x128xbf16>
        tpu.vector_store %arg10[%31, %c0_19], %30 {strides = array<i32>} : memref<128x128xbf16, #tpu.memory_space<vmem>>, vector<128x128xbf16>,
      } else {
      }
      %c1_i32 = arith.constant 1 : i32
      %23 = arith.cmpi eq, %arg0, %c1_i32 : i32
      %24 = arith.extui %23 : i1 to i32
      %c0_i32_14 = arith.constant 0 : i32
      %25 = arith.cmpi ne, %24, %c0_i32_14 : i32
      scf.if %25 {
        %26 = arith.index_cast %1 : i32 to index
        %c0_15 = arith.constant 0 : index
        %27 = vector.load %arg11[%26, %c0_15] : memref<128x128xbf16, #tpu.memory_space<vmem>>, vector<128x128xbf16>
        %c0_16 = arith.constant 0 : index
        %c0_17 = arith.constant 0 : index
        %28 = vector.load %arg7[%c0_16, %c0_17] : memref<128x128xbf16, #tpu.memory_space<vmem>>, vector<128x128xbf16>
        %cst_18 = arith.constant dense<0.000000e+00> : vector<128x128xf32>
        %29 = tpu.matmul %27, %28, %cst_18 {dimension_numbers = #tpu.dot_dimension_numbers<[1], [0], [0], [1], [0, 0, 1, 1], [], []>} : vector<128x128xbf16>, vector<128x128xbf16>, vector<128x128xf32> -> vector<128x128xf32>
        %30 = arith.truncf %29 : vector<128x128xf32> to vector<128x128xbf16>
        %31 = arith.index_cast %1 : i32 to index
        %c0_19 = arith.constant 0 : index
        %32 = vector.load %arg10[%31, %c0_19] : memref<128x128xbf16, #tpu.memory_space<vmem>>, vector<128x128xbf16>
        tpu.vector_store %arg10[%31, %c0_19], %30 {strides = array<i32>} : memref<128x128xbf16, #tpu.memory_space<vmem>>, vector<128x128xbf16>,
      } else {
      }
    } else {
    }
    %c0 = arith.constant 0 : index
    %c0_4 = arith.constant 0 : index
    %10 = vector.load %arg12[%c0, %c0_4] : memref<128x128xf32, #tpu.memory_space<vmem>>, vector<128x128xf32>
    %c0_5 = arith.constant 0 : index
    %c0_6 = arith.constant 0 : index
    %11 = vector.load %arg3[%c0_5, %c0_6] : memref<128x128xbf16, #tpu.memory_space<vmem>>, vector<128x128xbf16>
    %12 = arith.index_cast %1 : i32 to index
    %c0_7 = arith.constant 0 : index
    %13 = vector.load %arg10[%12, %c0_7] : memref<128x128xbf16, #tpu.memory_space<vmem>>, vector<128x128xbf16>
    %cst = arith.constant dense<0.000000e+00> : vector<128x128xf32>
    %14 = tpu.matmul %11, %13, %cst {dimension_numbers = #tpu.dot_dimension_numbers<[1], [0], [0], [1], [0, 0, 1, 1], [], []>} : vector<128x128xbf16>, vector<128x128xbf16>, vector<128x128xf32> -> vector<128x128xf32>
    %15 = arith.addf %10, %14 : vector<128x128xf32>
    %c0_8 = arith.constant 0 : index
    %c0_9 = arith.constant 0 : index
    %16 = vector.load %arg12[%c0_8, %c0_9] : memref<128x128xf32, #tpu.memory_space<vmem>>, vector<128x128xf32>
    tpu.vector_store %arg12[%c0_8, %c0_9], %15 {strides = array<i32>} : memref<128x128xf32, #tpu.memory_space<vmem>>, vector<128x128xf32>,
    %c0_i32_10 = arith.constant 0 : i32
    %17 = arith.cmpi eq, %arg2, %c0_i32_10 : i32
    %18 = arith.extui %17 : i1 to i32
    %c0_i32_11 = arith.constant 0 : i32
    %19 = arith.cmpi ne, %18, %c0_i32_11 : i32
    scf.if %19 {
      %c0_i32_12 = arith.constant 0 : i32
      %20 = arith.cmpi eq, %arg0, %c0_i32_12 : i32
      %21 = arith.extui %20 : i1 to i32
      %c0_i32_13 = arith.constant 0 : i32
      %22 = arith.cmpi ne, %21, %c0_i32_13 : i32
      scf.if %22 {
        %c0_15 = arith.constant 0 : index
        %c0_16 = arith.constant 0 : index
        %26 = vector.load %arg12[%c0_15, %c0_16] : memref<128x128xf32, #tpu.memory_space<vmem>>, vector<128x128xf32>
        %c0_17 = arith.constant 0 : index
        %c0_18 = arith.constant 0 : index
        %27 = vector.load %arg6[%c0_17, %c0_18] : memref<1x128xf32, #tpu.memory_space<vmem>>, vector<1x128xf32>
        %28 = vector.broadcast %27 : vector<1x128xf32> to vector<128x128xf32>
        %29 = arith.addf %26, %28 : vector<128x128xf32>
        %cst_19 = arith.constant 0.000000e+00 : f32
        %30 = vector.broadcast %cst_19 : f32 to vector<128x128xf32>
        %31 = arith.maximumf %29, %30 : vector<128x128xf32>
        %32 = arith.truncf %31 : vector<128x128xf32> to vector<128x128xbf16>
        %33 = arith.index_cast %3 : i32 to index
        %c0_20 = arith.constant 0 : index
        %34 = vector.load %arg11[%33, %c0_20] : memref<128x128xbf16, #tpu.memory_space<vmem>>, vector<128x128xbf16>
        tpu.vector_store %arg11[%33, %c0_20], %32 {strides = array<i32>} : memref<128x128xbf16, #tpu.memory_space<vmem>>, vector<128x128xbf16>,
        %c0_21 = arith.constant 0 : index
        %c0_22 = arith.constant 0 : index
        %35 = vector.load %arg9[%c0_21, %c0_22] : memref<128x128xf32, #tpu.memory_space<vmem>>, vector<128x128xf32>
        tpu.vector_store %arg9[%c0_21, %c0_22], %31 {strides = array<i32>} : memref<128x128xf32, #tpu.memory_space<vmem>>, vector<128x128xf32>,
      } else {
      }
      %c1_i32 = arith.constant 1 : i32
      %23 = arith.cmpi eq, %arg0, %c1_i32 : i32
      %24 = arith.extui %23 : i1 to i32
      %c0_i32_14 = arith.constant 0 : i32
      %25 = arith.cmpi ne, %24, %c0_i32_14 : i32
      scf.if %25 {
        %c0_15 = arith.constant 0 : index
        %c0_16 = arith.constant 0 : index
        %26 = vector.load %arg12[%c0_15, %c0_16] : memref<128x128xf32, #tpu.memory_space<vmem>>, vector<128x128xf32>
        %c0_17 = arith.constant 0 : index
        %c0_18 = arith.constant 0 : index
        %27 = vector.load %arg8[%c0_17, %c0_18] : memref<1x128xf32, #tpu.memory_space<vmem>>, vector<1x128xf32>
        %28 = vector.broadcast %27 : vector<1x128xf32> to vector<128x128xf32>
        %29 = arith.addf %26, %28 : vector<128x128xf32>
        %cst_19 = arith.constant 0.000000e+00 : f32
        %30 = vector.broadcast %cst_19 : f32 to vector<128x128xf32>
        %31 = arith.maximumf %29, %30 : vector<128x128xf32>
        %c0_20 = arith.constant 0 : index
        %c0_21 = arith.constant 0 : index
        %32 = vector.load %arg9[%c0_20, %c0_21] : memref<128x128xf32, #tpu.memory_space<vmem>>, vector<128x128xf32>
        tpu.vector_store %arg9[%c0_20, %c0_21], %31 {strides = array<i32>} : memref<128x128xf32, #tpu.memory_space<vmem>>, vector<128x128xf32>,
      } else {
      }
    } else {
    }
    return
  }
  func.func @transform_0(%arg0: i32, %arg1: i32, %arg2: i32) -> (i32, i32) {
    %c0_i32 = arith.constant 0 : i32
    return %arg1, %arg2 : i32, i32
  }
  func.func @transform_1(%arg0: i32, %arg1: i32, %arg2: i32) -> (i32, i32) {
    %c0_i32 = arith.constant 0 : i32
    %c0_i32_0 = arith.constant 0 : i32
    %c0_i32_1 = arith.constant 0 : i32
    return %c0_i32, %c0_i32_0 : i32, i32
  }
  func.func @transform_2(%arg0: i32, %arg1: i32, %arg2: i32) -> (i32, i32) {
    %c0_i32 = arith.constant 0 : i32
    %c0_i32_0 = arith.constant 0 : i32
    %c0_i32_1 = arith.constant 0 : i32
    return %c0_i32, %c0_i32_0 : i32, i32
  }
  func.func @transform_3(%arg0: i32, %arg1: i32, %arg2: i32) -> (i32, i32) {
    %c0_i32 = arith.constant 0 : i32
    %c0_i32_0 = arith.constant 0 : i32
    %c0_i32_1 = arith.constant 0 : i32
    return %c0_i32, %c0_i32_0 : i32, i32
  }
  func.func @transform_4(%arg0: i32, %arg1: i32, %arg2: i32) -> (i32, i32) {
    %c0_i32 = arith.constant 0 : i32
    %c0_i32_0 = arith.constant 0 : i32
    %c0_i32_1 = arith.constant 0 : i32
    return %c0_i32, %c0_i32_0 : i32, i32
  }
  func.func @transform_5(%arg0: i32, %arg1: i32, %arg2: i32) -> (i32, i32) {
    %c0_i32 = arith.constant 0 : i32
    %c0_i32_0 = arith.constant 0 : i32
    %c0_i32_1 = arith.constant 0 : i32
    return %c0_i32, %c0_i32_0 : i32, i32
  }
  func.func @transform_6(%arg0: i32, %arg1: i32, %arg2: i32) -> (i32, i32) {
    %c0_i32 = arith.constant 0 : i32
    %c0_i32_0 = arith.constant 0 : i32
    return %arg1, %c0_i32 : i32, i32
  }
}

</mosaic_0001>

<bundles_post_ra>
// kernel: model_forward.1
= control target key start
LH: loop header
LB: loop body
LE: loop exit
PB: predicated region body
PF: predicated region fallthrough
CT: control target
= control target key end

     0   :  { %s1592_s21 = smov 0   ;;  %s1594_s22 = smov 0   ;;  %s1829_s0 = inlined_call_operand.vmem [shape: bf16[128,128], index: 0, kind: input, shape index: {}]   ;;  %s1830_s1 = inlined_call_operand.vmem [shape: bf16[128,128], index: 1, kind: input, shape index: {}]   ;;  %s1831_s2 = inlined_call_operand.vmem [shape: bf16[128,128], index: 2, kind: input, shape index: {}]   ;;  %s1832_s3 = inlined_call_operand.vmem [shape: f32[1,128], index: 3, kind: input, shape index: {}]   ;;  %s1833_s4 = inlined_call_operand.vmem [shape: bf16[128,128], index: 4, kind: input, shape index: {}]   ;;  %s1834_s5 = inlined_call_operand.vmem [shape: f32[1,128], index: 5, kind: input, shape index: {}]   ;;  %s1835_s6 = inlined_call_operand.vmem [shape: f32[128,128], index: 6, kind: output, shape index: {}]  }
   0x1   :  { %s1596_s23 = smov 0  }
   0x2 LB: > { %s35_s24 = sadd.s32 1, %s1550_s22  ;;  %p1240_p0 = scmp.ge.s32.totalorder %s1554_s23, 1  ;;  %s1554_s23 = sphi %s1596_s23, %s16_s23   ;;  %s1550_s22 = sphi %s1594_s22, %s1837_s22   ;;  %s1546_s21 = sphi %s1592_s21, %s1836_s21  }
   0x3   : > { %p37_p1 = scmp.ge.s32.totalorder %s35_s24, 2  ;;  %p237_p2 = scmp.lt.s32.totalorder %s1554_s23, 3 }
   0x5   : > { %s1839_s24 = smov (%p37_p1, %s35_s24), 0  ;;  %p238_p3 = pnand %p1240_p0, %p237_p2 }
   0x6   : > { %v1556_v0 = vmov (!%p238_p3), 0.0   ;;  %p1241_p4 = scmp.ne.s32.totalorder (!%p238_p3), %s1546_s21, 0 }
   0x7   : > { %241 = sbr.rel (%p238_p3) target bundleno = 821 (0x335), region = 44  ;;  %292 = vst [vmem:[#allocation4] sm:$0xff] (!%p238_p3), %v1556_v0  ;;  %293 = vst [vmem:[#allocation4 + $0x8] sm:$0xff] (!%p238_p3), %v1556_v0 }
   0x8   : > { %294 = vst [vmem:[#allocation4 + $0x10] sm:$0xff] (!%p238_p3), %v1556_v0  ;;  %295 = vst [vmem:[#allocation4 + $0x18] sm:$0xff] (!%p238_p3), %v1556_v0 }
   0x9   : > { %296 = vst [vmem:[#allocation4 + $0x20] sm:$0xff] (!%p238_p3), %v1556_v0  ;;  %297 = vst [vmem:[#allocation4 + $0x28] sm:$0xff] (!%p238_p3), %v1556_v0 }
   0xa   : > { %298 = vst [vmem:[#allocation4 + $0x30] sm:$0xff] (!%p238_p3), %v1556_v0  ;;  %299 = vst [vmem:[#allocation4 + $0x38] sm:$0xff] (!%p238_p3), %v1556_v0 }
   0xb   : > { %300 = vst [vmem:[#allocation4 + $0x40] sm:$0xff] (!%p238_p3), %v1556_v0  ;;  %301 = vst [vmem:[#allocation4 + $0x48] sm:$0xff] (!%p238_p3), %v1556_v0 }
   0xc   : > { %302 = vst [vmem:[#allocation4 + $0x50] sm:$0xff] (!%p238_p3), %v1556_v0  ;;  %303 = vst [vmem:[#allocation4 + $0x58] sm:$0xff] (!%p238_p3), %v1556_v0 }
   0xd   : > { %304 = vst [vmem:[#allocation4 + $0x60] sm:$0xff] (!%p238_p3), %v1556_v0  ;;  %305 = vst [vmem:[#allocation4 + $0x68] sm:$0xff] (!%p238_p3), %v1556_v0 }
   0xe   : > { %306 = vst [vmem:[#allocation4 + $0x70] sm:$0xff] %v1556_v0  ;;  %307 = vst [vmem:[#allocation4 + $0x78] sm:$0xff] %v1556_v0  ;;  %315 = sbr.rel (%p1241_p4) target bundleno = 273 (0x111), region = 56  ;;  %v1500_v1 = vld [vmem:[%s1831_s2] sm:$0xff] (!%p1241_p4)   ;;  %v1501_v2 = vld [vmem:[%s1831_s2 + $0x8] sm:$0xff] (!%p1241_p4)  }
   0xf   : > { %1331 = vmatprep.subr.bf16.mxu0 (!%p1241_p4), %v1500_v1  ;;  %1427 = vmatprep.subr.bf16.mxu1 (!%p1241_p4), %v1500_v1  ;;  %v1502_v3 = vld [vmem:[%s1831_s2 + $0x10] sm:$0xff] (!%p1241_p4)   ;;  %v1503_v4 = vld [vmem:[%s1831_s2 + $0x18] sm:$0xff] (!%p1241_p4)   ;;  %v1508_v5 = vld [vmem:[%s1830_s1] sm:$0xff] (!%p1241_p4)  }
  0x10   : > { %1332 = vmatpush3.bf16.msra.mxu0 (!%p1241_p4), %v1500_v1  ;;  %1435 = vmatpush3.bf16.msra.mxu1 (!%p1241_p4), %v1500_v1  ;;  %v1509_v6 = vld [vmem:[%s1830_s1 + $0x20] sm:$0xff] (!%p1241_p4)   ;;  %v1505_v8 = vld [vmem:[%s1831_s2 + $0x28] sm:$0xff] (!%p1241_p4)   ;;  %v1506_v9 = vld [vmem:[%s1831_s2 + $0x30] sm:$0xff] (!%p1241_p4)  }
  0x11   : > { %1333 = vmatprep.subr.bf16.mxu0 (!%p1241_p4), %v1501_v2  ;;  %1428 = vmatprep.subr.bf16.mxu1 (!%p1241_p4), %v1501_v2  ;;  %v1504_v7 = vld [vmem:[%s1831_s2 + $0x20] sm:$0xff] (!%p1241_p4)   ;;  %v1507_v10 = vld [vmem:[%s1831_s2 + $0x38] sm:$0xff] (!%p1241_p4)   ;;  %v1510_v11 = vld [vmem:[%s1830_s1 + $0x8] sm:$0xff] (!%p1241_p4)  }
  0x12   : > { %1347 = vmatprep.mubr.bf16.mxu0 (!%p1241_p4), %v1508_v5  ;;  %1355 = vmatprep.mubr.bf16.mxu1 (!%p1241_p4), %v1509_v6  ;;  %v1511_v12 = vld [vmem:[%s1830_s1 + $0x28] sm:$0xff] (!%p1241_p4)   ;;  %v1512_v13 = vld [vmem:[%s1830_s1 + $0x10] sm:$0xff] (!%p1241_p4)   ;;  %v1514_v15 = vld [vmem:[%s1830_s1 + $0x18] sm:$0xff] (!%p1241_p4)  }
  0x13   : > { %v1513_v14 = vld [vmem:[%s1830_s1 + $0x30] sm:$0xff] (!%p1241_p4)   ;;  %v1515_v16 = vld [vmem:[%s1830_s1 + $0x38] sm:$0xff] (!%p1241_p4)  }
  0x14   : > { %1334 = vmatpush3.bf16.msra.mxu0 (!%p1241_p4), %v1501_v2  ;;  %1436 = vmatpush3.bf16.msra.mxu1 (!%p1241_p4), %v1501_v2 }
  0x15   : > { %1335 = vmatprep.subr.bf16.mxu0 %v1502_v3  ;;  %1429 = vmatprep.subr.bf16.mxu1 %v1502_v3 }
  0x18   : > { %1336 = vmatpush3.bf16.msra.mxu0 %v1502_v3  ;;  %1437 = vmatpush3.bf16.msra.mxu1 %v1502_v3 }
  0x19   : > { %1337 = vmatprep.subr.bf16.mxu0 %v1503_v4  ;;  %1430 = vmatprep.subr.bf16.mxu1 %v1503_v4 }
  0x1c   : > { %1338 = vmatpush3.bf16.msra.mxu0 %v1503_v4  ;;  %1438 = vmatpush3.bf16.msra.mxu1 %v1503_v4 }
  0x1d   : > { %1339 = vmatprep.subr.bf16.mxu0 %v1504_v7  ;;  %1431 = vmatprep.subr.bf16.mxu1 %v1504_v7 }
  0x20   : > { %1340 = vmatpush3.bf16.msra.mxu0 %v1504_v7  ;;  %1439 = vmatpush3.bf16.msra.mxu1 %v1504_v7 }
  0x21   : > { %1341 = vmatprep.subr.bf16.mxu0 %v1505_v8  ;;  %1432 = vmatprep.subr.bf16.mxu1 %v1505_v8 }
  0x24   : > { %1342 = vmatpush3.bf16.msra.mxu0 %v1505_v8  ;;  %1440 = vmatpush3.bf16.msra.mxu1 %v1505_v8 }
  0x25   : > { %1343 = vmatprep.subr.bf16.mxu0 %v1506_v9  ;;  %1433 = vmatprep.subr.bf16.mxu1 %v1506_v9 }
  0x28   : > { %1344 = vmatpush3.bf16.msra.mxu0 %v1506_v9  ;;  %1441 = vmatpush3.bf16.msra.mxu1 %v1506_v9 }
  0x29   : > { %1345 = vmatprep.subr.bf16.mxu0 %v1507_v10  ;;  %1434 = vmatprep.subr.bf16.mxu1 %v1507_v10 }
  0x2c   : > { %1346 = vmatpush3.bf16.msra.mxu0 %v1507_v10  ;;  %1442 = vmatpush3.bf16.msra.mxu1 %v1507_v10 }
  0x2f   : > { %1348 = vmatmul.mubr.bf16.vlgmr.msra.gmra.mrb[0].mxu0 %v1510_v11  ;;  %1356 = vmatmul.mubr.bf16.vlgmr.msra.gmra.mrb[0].mxu1 %v1511_v12 }
  0x30   : > { %1351 = vmatprep.mubr.bf16.mxu0 %v1512_v13  ;;  %1359 = vmatprep.mubr.bf16.mxu1 %v1513_v14 }
  0x37   : > { %1352 = vmatmul.mubr.bf16.gmra.mrb[4].mxu0 %v1514_v15  ;;  %1360 = vmatmul.mubr.bf16.gmra.mrb[4].mxu1 %v1515_v16 }
 0x102   : > { %v1349_v17 = vpop.f32.mrb[0].mxu0  ;;  %v1357_v18 = vpop.f32.mrb[0].mxu1 }
 0x103   : > { %v482_v19 = vpop.f32.mrb[1].mxu0  ;;  %v514_v20 = vpop.f32.mrb[1].mxu1 }
 0x104   : > { %v1350_v21 = vpop.f32.mrb[2].mxu0  ;;  %v1358_v22 = vpop.f32.mrb[2].mxu1 }
 0x105   : > { %v546_v23 = vpack.c.bf16 %v1350_v21, %v1349_v17  ;;  %v550_v24 = vpack.c.bf16 %v1358_v22, %v1357_v18  ;;  %v485_v25 = vpop.f32.mrb[3].mxu0  ;;  %v517_v26 = vpop.f32.mrb[3].mxu1 }
 0x106   : > { %v545_v27 = vpack.c.bf16 %v485_v25, %v482_v19  ;;  %v549_v28 = vpack.c.bf16 %v517_v26, %v514_v20 }
 0x107   : > { %558 = vst [vmem:[#allocation2 + $0x8] sm:$0xff] %v546_v23  ;;  %562 = vst [vmem:[#allocation2 + $0x28] sm:$0xff] %v550_v24 }
 0x108   : > { %557 = vst [vmem:[#allocation2] sm:$0xff] %v545_v27  ;;  %561 = vst [vmem:[#allocation2 + $0x20] sm:$0xff] %v549_v28 }
 0x10a   : > { %v1353_v29 = vpop.f32.mrb[4].mxu0  ;;  %v1361_v30 = vpop.f32.mrb[4].mxu1 }
 0x10b   : > { %v498_v31 = vpop.f32.mrb[5].mxu0  ;;  %v530_v32 = vpop.f32.mrb[5].mxu1 }
 0x10c   : > { %v1354_v33 = vpop.f32.mrb[6].mxu0  ;;  %v1362_v34 = vpop.f32.mrb[6].mxu1 }
 0x10d   : > { %v548_v35 = vpack.c.bf16 %v1354_v33, %v1353_v29  ;;  %v552_v36 = vpack.c.bf16 %v1362_v34, %v1361_v30  ;;  %v501_v37 = vpop.f32.mrb[7].mxu0  ;;  %v533_v38 = vpop.f32.mrb[7].mxu1 }
 0x10e   : > { %v547_v39 = vpack.c.bf16 %v501_v37, %v498_v31  ;;  %v551_v40 = vpack.c.bf16 %v533_v38, %v530_v32 }
 0x10f   : > { %560 = vst [vmem:[#allocation2 + $0x18] sm:$0xff] %v548_v35  ;;  %564 = vst [vmem:[#allocation2 + $0x38] sm:$0xff] %v552_v36 }
 0x110   : > { %559 = vst [vmem:[#allocation2 + $0x10] sm:$0xff] %v547_v39  ;;  %563 = vst [vmem:[#allocation2 + $0x30] sm:$0xff] %v551_v40 }
 0x111 PF: > { %p1258_p5 = scmp.ne.s32.totalorder %s1546_s21, 1 }
 0x112   : > { %v1516_v41 = vld [vmem:[%s1833_s4] sm:$0xff] (!%p1258_p5)   ;;  %v1517_v42 = vld [vmem:[%s1833_s4 + $0x8] sm:$0xff] (!%p1258_p5)   ;;  %v1518_v43 = vld [vmem:[%s1833_s4 + $0x10] sm:$0xff] (!%p1258_p5)  }
 0x113   : > { %568 = sbr.rel (%p1258_p5) target bundleno = 533 (0x215), region = 60  ;;  %1363 = vmatprep.subr.bf16.mxu0 (!%p1258_p5), %v1516_v41  ;;  %1443 = vmatprep.subr.bf16.mxu1 (!%p1258_p5), %v1516_v41  ;;  %v1519_v44 = vld [vmem:[%s1833_s4 + $0x18] sm:$0xff] (!%p1258_p5)   ;;  %v573_v45 = vld [vmem:[#allocation3] sm:$0xff] (!%p1258_p5)  ;;  %v1521_v48 = vld [vmem:[%s1833_s4 + $0x28] sm:$0xff] (!%p1258_p5)  }
 0x114   : > { %1364 = vmatpush3.bf16.msra.mxu0 (!%p1258_p5), %v1516_v41  ;;  %1451 = vmatpush3.bf16.msra.mxu1 (!%p1258_p5), %v1516_v41  ;;  %v577_v46 = vld [vmem:[#allocation3 + $0x20] sm:$0xff] (!%p1258_p5)  ;;  %v1522_v49 = vld [vmem:[%s1833_s4 + $0x30] sm:$0xff] (!%p1258_p5)   ;;  %v1523_v50 = vld [vmem:[%s1833_s4 + $0x38] sm:$0xff] (!%p1258_p5)  }
 0x115   : > { %1365 = vmatprep.subr.bf16.mxu0 (!%p1258_p5), %v1517_v42  ;;  %1444 = vmatprep.subr.bf16.mxu1 (!%p1258_p5), %v1517_v42  ;;  %v1520_v47 = vld [vmem:[%s1833_s4 + $0x20] sm:$0xff] (!%p1258_p5)   ;;  %v574_v51 = vld [vmem:[#allocation3 + $0x8] sm:$0xff] (!%p1258_p5)  ;;  %v575_v53 = vld [vmem:[#allocation3 + $0x10] sm:$0xff] (!%p1258_p5) }
 0x116   : > { %1379 = vmatprep.mubr.bf16.mxu0 (!%p1258_p5), %v573_v45  ;;  %1387 = vmatprep.mubr.bf16.mxu1 (!%p1258_p5), %v577_v46  ;;  %v578_v52 = vld [vmem:[#allocation3 + $0x28] sm:$0xff] (!%p1258_p5)  ;;  %v579_v54 = vld [vmem:[#allocation3 + $0x30] sm:$0xff] (!%p1258_p5)  ;;  %v576_v55 = vld [vmem:[#allocation3 + $0x18] sm:$0xff] (!%p1258_p5) }
 0x117   : > { %v580_v56 = vld [vmem:[#allocation3 + $0x38] sm:$0xff] (!%p1258_p5) }
 0x118   : > { %1366 = vmatpush3.bf16.msra.mxu0 (!%p1258_p5), %v1517_v42  ;;  %1452 = vmatpush3.bf16.msra.mxu1 (!%p1258_p5), %v1517_v42 }
 0x119   : > { %1367 = vmatprep.subr.bf16.mxu0 (!%p1258_p5), %v1518_v43  ;;  %1445 = vmatprep.subr.bf16.mxu1 (!%p1258_p5), %v1518_v43 }
 0x11c   : > { %1368 = vmatpush3.bf16.msra.mxu0 %v1518_v43  ;;  %1453 = vmatpush3.bf16.msra.mxu1 %v1518_v43 }
 0x11d   : > { %1369 = vmatprep.subr.bf16.mxu0 %v1519_v44  ;;  %1446 = vmatprep.subr.bf16.mxu1 %v1519_v44 }
 0x120   : > { %1370 = vmatpush3.bf16.msra.mxu0 %v1519_v44  ;;  %1454 = vmatpush3.bf16.msra.mxu1 %v1519_v44 }
 0x121   : > { %1371 = vmatprep.subr.bf16.mxu0 %v1520_v47  ;;  %1447 = vmatprep.subr.bf16.mxu1 %v1520_v47 }
 0x124   : > { %1372 = vmatpush3.bf16.msra.mxu0 %v1520_v47  ;;  %1455 = vmatpush3.bf16.msra.mxu1 %v1520_v47 }
 0x125   : > { %1373 = vmatprep.subr.bf16.mxu0 %v1521_v48  ;;  %1448 = vmatprep.subr.bf16.mxu1 %v1521_v48 }
 0x128   : > { %1374 = vmatpush3.bf16.msra.mxu0 %v1521_v48  ;;  %1456 = vmatpush3.bf16.msra.mxu1 %v1521_v48 }
 0x129   : > { %1375 = vmatprep.subr.bf16.mxu0 %v1522_v49  ;;  %1449 = vmatprep.subr.bf16.mxu1 %v1522_v49 }
 0x12c   : > { %1376 = vmatpush3.bf16.msra.mxu0 %v1522_v49  ;;  %1457 = vmatpush3.bf16.msra.mxu1 %v1522_v49 }
 0x12d   : > { %1377 = vmatprep.subr.bf16.mxu0 %v1523_v50  ;;  %1450 = vmatprep.subr.bf16.mxu1 %v1523_v50 }
 0x130   : > { %1378 = vmatpush3.bf16.msra.mxu0 %v1523_v50  ;;  %1458 = vmatpush3.bf16.msra.mxu1 %v1523_v50 }
 0x133   : > { %1380 = vmatmul.mubr.bf16.vlgmr.msra.gmra.mrb[0].mxu0 %v574_v51  ;;  %1388 = vmatmul.mubr.bf16.vlgmr.msra.gmra.mrb[0].mxu1 %v578_v52 }
 0x134   : > { %1383 = vmatprep.mubr.bf16.mxu0 %v575_v53  ;;  %1391 = vmatprep.mubr.bf16.mxu1 %v579_v54 }
 0x13b   : > { %1384 = vmatmul.mubr.bf16.gmra.mrb[4].mxu0 %v576_v55  ;;  %1392 = vmatmul.mubr.bf16.gmra.mrb[4].mxu1 %v580_v56 }
 0x206   : > { %v1381_v57 = vpop.f32.mrb[0].mxu0  ;;  %v1389_v58 = vpop.f32.mrb[0].mxu1 }
 0x207   : > { %v679_v59 = vpop.f32.mrb[1].mxu0  ;;  %v711_v60 = vpop.f32.mrb[1].mxu1 }
 0x208   : > { %v1382_v61 = vpop.f32.mrb[2].mxu0  ;;  %v1390_v62 = vpop.f32.mrb[2].mxu1 }
 0x209   : > { %v743_v63 = vpack.c.bf16 %v1382_v61, %v1381_v57  ;;  %v747_v0 = vpack.c.bf16 %v1390_v62, %v1389_v58  ;;  %v682_v1 = vpop.f32.mrb[3].mxu0  ;;  %v714_v2 = vpop.f32.mrb[3].mxu1 }
 0x20a   : > { %v742_v3 = vpack.c.bf16 %v682_v1, %v679_v59  ;;  %v746_v4 = vpack.c.bf16 %v714_v2, %v711_v60 }
 0x20b   : > { %753 = vst [vmem:[#allocation2 + $0x8] sm:$0xff] %v743_v63  ;;  %757 = vst [vmem:[#allocation2 + $0x28] sm:$0xff] %v747_v0 }
 0x20c   : > { %752 = vst [vmem:[#allocation2] sm:$0xff] %v742_v3  ;;  %756 = vst [vmem:[#allocation2 + $0x20] sm:$0xff] %v746_v4 }
 0x20e   : > { %v1385_v5 = vpop.f32.mrb[4].mxu0  ;;  %v1393_v6 = vpop.f32.mrb[4].mxu1 }
 0x20f   : > { %v695_v7 = vpop.f32.mrb[5].mxu0  ;;  %v727_v8 = vpop.f32.mrb[5].mxu1 }
 0x210   : > { %v1386_v9 = vpop.f32.mrb[6].mxu0  ;;  %v1394_v10 = vpop.f32.mrb[6].mxu1 }
 0x211   : > { %v745_v11 = vpack.c.bf16 %v1386_v9, %v1385_v5  ;;  %v749_v12 = vpack.c.bf16 %v1394_v10, %v1393_v6  ;;  %v698_v13 = vpop.f32.mrb[7].mxu0  ;;  %v730_v14 = vpop.f32.mrb[7].mxu1 }
 0x212   : > { %v744_v15 = vpack.c.bf16 %v698_v13, %v695_v7  ;;  %v748_v16 = vpack.c.bf16 %v730_v14, %v727_v8 }
 0x213   : > { %755 = vst [vmem:[#allocation2 + $0x18] sm:$0xff] %v745_v11  ;;  %759 = vst [vmem:[#allocation2 + $0x38] sm:$0xff] %v749_v12 }
 0x214   : > { %754 = vst [vmem:[#allocation2 + $0x10] sm:$0xff] %v744_v15  ;;  %758 = vst [vmem:[#allocation2 + $0x30] sm:$0xff] %v748_v16 }
 0x215 PF: > { %v796_v17 = vld [vmem:[#allocation2] sm:$0xff]  ;;  %v797_v18 = vld [vmem:[#allocation2 + $0x8] sm:$0xff]  ;;  %v1528_v29 = vld [vmem:[%s1829_s0 + $0x10] sm:$0xff]  }
 0x216   : > { %1395 = vmatprep.subr.bf16.mxu0 %v796_v17  ;;  %1459 = vmatprep.subr.bf16.mxu1 %v796_v17  ;;  %v1524_v20 = vld [vmem:[%s1829_s0] sm:$0xff]   ;;  %v801_v24 = vld [vmem:[#allocation2 + $0x28] sm:$0xff]  ;;  %v1529_v30 = vld [vmem:[%s1829_s0 + $0x30] sm:$0xff]  }
 0x217   : > { %1396 = vmatpush3.bf16.msra.mxu0 %v796_v17  ;;  %1467 = vmatpush3.bf16.msra.mxu1 %v796_v17  ;;  %v1525_v21 = vld [vmem:[%s1829_s0 + $0x20] sm:$0xff]   ;;  %v1526_v27 = vld [vmem:[%s1829_s0 + $0x8] sm:$0xff]   ;;  %v1530_v31 = vld [vmem:[%s1829_s0 + $0x18] sm:$0xff]  }
 0x218   : > { %1397 = vmatprep.subr.bf16.mxu0 %v797_v18  ;;  %1460 = vmatprep.subr.bf16.mxu1 %v797_v18  ;;  %v800_v23 = vld [vmem:[#allocation2 + $0x20] sm:$0xff]  ;;  %v1527_v28 = vld [vmem:[%s1829_s0 + $0x28] sm:$0xff]   ;;  %v1531_v32 = vld [vmem:[%s1829_s0 + $0x38] sm:$0xff]  }
 0x219   : > { %1411 = vmatprep.mubr.bf16.mxu0 %v1524_v20  ;;  %1419 = vmatprep.mubr.bf16.mxu1 %v1525_v21  ;;  %v762_v33 = vld [vmem:[#allocation4 + $0x10] sm:$0xff]  ;;  %v760_v35 = vld [vmem:[#allocation4] sm:$0xff]  ;;  %v763_v39 = vld [vmem:[#allocation4 + $0x18] sm:$0xff] }
 0x21a   : > { %v799_v22 = vld [vmem:[#allocation2 + $0x18] sm:$0xff]  ;;  %v770_v34 = vld [vmem:[#allocation4 + $0x50] sm:$0xff]  ;;  %v768_v36 = vld [vmem:[#allocation4 + $0x40] sm:$0xff] }
 0x21b   : > { %v798_v19 = vld [vmem:[#allocation2 + $0x10] sm:$0xff]  ;;  %1398 = vmatpush3.bf16.msra.mxu0 %v797_v18  ;;  %1468 = vmatpush3.bf16.msra.mxu1 %v797_v18  ;;  %v803_v26 = vld [vmem:[#allocation2 + $0x38] sm:$0xff]  ;;  %v761_v45 = vld [vmem:[#allocation4 + $0x8] sm:$0xff] }
 0x21c   : > { %1399 = vmatprep.subr.bf16.mxu0 %v798_v19  ;;  %1461 = vmatprep.subr.bf16.mxu1 %v798_v19  ;;  %v802_v25 = vld [vmem:[#allocation2 + $0x30] sm:$0xff]  ;;  %v771_v40 = vld [vmem:[#allocation4 + $0x58] sm:$0xff]  ;;  %v769_v46 = vld [vmem:[#allocation4 + $0x48] sm:$0xff] }
 0x21d   : > { %v766_v57 = vld [vmem:[#allocation4 + $0x30] sm:$0xff]  ;;  %v764_v59 = vld [vmem:[#allocation4 + $0x20] sm:$0xff]  ;;  %v767_v63 = vld [vmem:[#allocation4 + $0x38] sm:$0xff] }
 0x21e   : > { %v774_v58 = vld [vmem:[#allocation4 + $0x70] sm:$0xff]  ;;  %v772_v60 = vld [vmem:[#allocation4 + $0x60] sm:$0xff]  ;;  %v775_v0 = vld [vmem:[#allocation4 + $0x78] sm:$0xff] }
 0x21f   : > { %1400 = vmatpush3.bf16.msra.mxu0 %v798_v19  ;;  %1469 = vmatpush3.bf16.msra.mxu1 %v798_v19  ;;  %v765_v5 = vld [vmem:[#allocation4 + $0x28] sm:$0xff]  ;;  %v1276_v19 = vld [vmem:[%s1832_s3] ss:$0 sm:$0xff] (!%p1241_p4) }
 0x220   : > { %1401 = vmatprep.subr.bf16.mxu0 %v799_v22  ;;  %1462 = vmatprep.subr.bf16.mxu1 %v799_v22  ;;  %v773_v6 = vld [vmem:[#allocation4 + $0x68] sm:$0xff] }
 0x223   : > { %1402 = vmatpush3.bf16.msra.mxu0 %v799_v22  ;;  %1470 = vmatpush3.bf16.msra.mxu1 %v799_v22 }
 0x224   : > { %1403 = vmatprep.subr.bf16.mxu0 %v800_v23  ;;  %1463 = vmatprep.subr.bf16.mxu1 %v800_v23 }
 0x227   : > { %1404 = vmatpush3.bf16.msra.mxu0 %v800_v23  ;;  %1471 = vmatpush3.bf16.msra.mxu1 %v800_v23 }
 0x228   : > { %1405 = vmatprep.subr.bf16.mxu0 %v801_v24  ;;  %1464 = vmatprep.subr.bf16.mxu1 %v801_v24 }
 0x22b   : > { %1406 = vmatpush3.bf16.msra.mxu0 %v801_v24  ;;  %1472 = vmatpush3.bf16.msra.mxu1 %v801_v24 }
 0x22c   : > { %1407 = vmatprep.subr.bf16.mxu0 %v802_v25  ;;  %1465 = vmatprep.subr.bf16.mxu1 %v802_v25 }
 0x22f   : > { %1408 = vmatpush3.bf16.msra.mxu0 %v802_v25  ;;  %1473 = vmatpush3.bf16.msra.mxu1 %v802_v25 }
 0x230   : > { %1409 = vmatprep.subr.bf16.mxu0 %v803_v26  ;;  %1466 = vmatprep.subr.bf16.mxu1 %v803_v26 }
 0x233   : > { %1410 = vmatpush3.bf16.msra.mxu0 %v803_v26  ;;  %1474 = vmatpush3.bf16.msra.mxu1 %v803_v26 }
 0x236   : > { %1412 = vmatmul.mubr.bf16.vlgmr.msra.gmra.mrb[0].mxu0 %v1526_v27  ;;  %1420 = vmatmul.mubr.bf16.vlgmr.msra.gmra.mrb[0].mxu1 %v1527_v28 }
 0x237   : > { %1415 = vmatprep.mubr.bf16.mxu0 %v1528_v29  ;;  %1423 = vmatprep.mubr.bf16.mxu1 %v1529_v30 }
 0x23e   : > { %1416 = vmatmul.mubr.bf16.gmra.mrb[4].mxu0 %v1530_v31  ;;  %1424 = vmatmul.mubr.bf16.gmra.mrb[4].mxu1 %v1531_v32 }
 0x309   : > { %v1413_v37 = vpop.f32.mrb[0].mxu0  ;;  %v1421_v38 = vpop.f32.mrb[0].mxu1 }
 0x30a   : > { %v951_v41 = vadd.f32 %v1413_v37, %v762_v33  ;;  %v959_v42 = vadd.f32 %v1421_v38, %v770_v34  ;;  %v886_v43 = vpop.f32.mrb[1].mxu0  ;;  %v918_v44 = vpop.f32.mrb[1].mxu1 }
 0x30b   : > { %v949_v47 = vadd.f32 %v886_v43, %v760_v35  ;;  %v957_v48 = vadd.f32 %v918_v44, %v768_v36  ;;  %v1414_v49 = vpop.f32.mrb[2].mxu0  ;;  %v1422_v50 = vpop.f32.mrb[2].mxu1 }
 0x30c   : > { %967 = vst [vmem:[#allocation4 + $0x10] sm:$0xff] %v951_v41  ;;  %975 = vst [vmem:[#allocation4 + $0x50] sm:$0xff] %v959_v42  ;;  %v952_v51 = vadd.f32 %v1414_v49, %v763_v39  ;;  %v960_v52 = vadd.f32 %v1422_v50, %v771_v40  ;;  %v889_v53 = vpop.f32.mrb[3].mxu0  ;;  %v921_v54 = vpop.f32.mrb[3].mxu1 }
 0x30d   : > { %965 = vst [vmem:[#allocation4] sm:$0xff] %v949_v47  ;;  %973 = vst [vmem:[#allocation4 + $0x40] sm:$0xff] %v957_v48  ;;  %v950_v55 = vadd.f32 %v889_v53, %v761_v45  ;;  %v958_v56 = vadd.f32 %v921_v54, %v769_v46 }
 0x30e   : > { %968 = vst [vmem:[#allocation4 + $0x18] sm:$0xff] %v952_v51  ;;  %976 = vst [vmem:[#allocation4 + $0x58] sm:$0xff] %v960_v52 }
 0x30f   : > { %966 = vst [vmem:[#allocation4 + $0x8] sm:$0xff] %v950_v55  ;;  %974 = vst [vmem:[#allocation4 + $0x48] sm:$0xff] %v958_v56 }
 0x311   : > { %v1417_v61 = vpop.f32.mrb[4].mxu0  ;;  %v1425_v62 = vpop.f32.mrb[4].mxu1  ;;  %987 = sbr.rel (%p1241_p4) target bundleno = 807 (0x327), region = 68 }
 0x312   : > { %v955_v1 = vadd.f32 %v1417_v61, %v766_v57  ;;  %v963_v2 = vadd.f32 %v1425_v62, %v774_v58  ;;  %v902_v3 = vpop.f32.mrb[5].mxu0  ;;  %v934_v4 = vpop.f32.mrb[5].mxu1 }
 0x313   : > { %v953_v7 = vadd.f32 %v902_v3, %v764_v59  ;;  %v961_v8 = vadd.f32 %v934_v4, %v772_v60  ;;  %v1418_v9 = vpop.f32.mrb[6].mxu0  ;;  %v1426_v10 = vpop.f32.mrb[6].mxu1  ;;  %v990_v22 = vld [vmem:[#allocation4 + $0x10] sm:$0xff] (!%p1241_p4) }
 0x314   : > { %971 = vst [vmem:[#allocation4 + $0x30] sm:$0xff] %v955_v1  ;;  %979 = vst [vmem:[#allocation4 + $0x70] sm:$0xff] %v963_v2  ;;  %v956_v11 = vadd.f32 %v1418_v9, %v767_v63  ;;  %v964_v12 = vadd.f32 %v1426_v10, %v775_v0  ;;  %v905_v13 = vpop.f32.mrb[7].mxu0  ;;  %v937_v14 = vpop.f32.mrb[7].mxu1  ;;  %v988_v17 = vld [vmem:[#allocation4] sm:$0xff] (!%p1241_p4)  ;;  %v1013_v25 = vadd.f32 (!%p1241_p4), %v1276_v19, %v990_v22  ;;  %v998_v37 = vld [vmem:[#allocation4 + $0x50] sm:$0xff] (!%p1241_p4) }
 0x315   : > { %969 = vst [vmem:[#allocation4 + $0x20] sm:$0xff] %v953_v7  ;;  %977 = vst [vmem:[#allocation4 + $0x60] sm:$0xff] %v961_v8  ;;  %v954_v15 = vadd.f32 %v905_v13, %v765_v5  ;;  %v962_v16 = vadd.f32 %v937_v14, %v773_v6  ;;  %v1011_v20 = vadd.f32 (!%p1241_p4), %v1276_v19, %v988_v17  ;;  %v991_v23 = vld [vmem:[#allocation4 + $0x18] sm:$0xff] (!%p1241_p4)  ;;  %v996_v35 = vld [vmem:[#allocation4 + $0x40] sm:$0xff] (!%p1241_p4) }
 0x316   : > { %972 = vst [vmem:[#allocation4 + $0x38] sm:$0xff] %v956_v11  ;;  %980 = vst [vmem:[#allocation4 + $0x78] sm:$0xff] %v964_v12  ;;  %v989_v18 = vld [vmem:[#allocation4 + $0x8] sm:$0xff] (!%p1241_p4)  ;;  %v1014_v26 = vadd.f32 (!%p1241_p4), %v1276_v19, %v991_v23  ;;  %v1029_v38 = vmax.f32 (!%p1241_p4), %v1013_v25, 0.0  ;;  %v999_v42 = vld [vmem:[#allocation4 + $0x58] sm:$0xff] (!%p1241_p4)  ;;  %v1019_v47 = vadd.f32 (!%p1241_p4), %v1276_v19, %v996_v35  ;;  %v1021_v52 = vadd.f32 (!%p1241_p4), %v1276_v19, %v998_v37 }
 0x317   : > { %970 = vst [vmem:[#allocation4 + $0x28] sm:$0xff] %v954_v15  ;;  %978 = vst [vmem:[#allocation4 + $0x68] sm:$0xff] %v962_v16  ;;  %v1012_v21 = vadd.f32 (!%p1241_p4), %v1276_v19, %v989_v18  ;;  %v1027_v31 = vmax.f32 (!%p1241_p4), %v1011_v20, 0.0  ;;  %v997_v36 = vld [vmem:[#allocation4 + $0x48] sm:$0xff] (!%p1241_p4)  ;;  %v1022_v57 = vadd.f32 (!%p1241_p4), %v1276_v19, %v999_v42 }
 0x318   : > { %v1030_v39 = vmax.f32 %v1014_v26, 0.0  ;;  %1065 = vst [vmem:[%s1835_s6 + $0x10] sm:$0xff] %v1029_v38  ;;  %v1020_v51 = vadd.f32 %v1276_v19, %v997_v36  ;;  %v1035_v56 = vmax.f32 %v1019_v47, 0.0  ;;  %v1037_v61 = vmax.f32 %v1021_v52, 0.0 }
 0x319   : > { %v1028_v32 = vmax.f32 %v1012_v21, 0.0  ;;  %1063 = vst [vmem:[%s1835_s6] sm:$0xff] %v1027_v31  ;;  %v1038_v63 = vmax.f32 %v1022_v57, 0.0 }
 0x31a   : > { %v1044_v49 = vpack.c.bf16 %v1030_v39, %v1029_v38  ;;  %1066 = vst [vmem:[%s1835_s6 + $0x18] sm:$0xff] %v1030_v39  ;;  %v1036_v60 = vmax.f32 %v1020_v51, 0.0  ;;  %1071 = vst [vmem:[%s1835_s6 + $0x40] sm:$0xff] %v1035_v56 }
 0x31b   : > { %v994_v29 = vld [vmem:[#allocation4 + $0x30] sm:$0xff]  ;;  %v1043_v44 = vpack.c.bf16 %v1028_v32, %v1027_v31  ;;  %1064 = vst [vmem:[%s1835_s6 + $0x8] sm:$0xff] %v1028_v32  ;;  %1073 = vst [vmem:[%s1835_s6 + $0x50] sm:$0xff] %v1037_v61  ;;  %v1048_v5 = vpack.c.bf16 %v1038_v63, %v1037_v61 }
 0x31c   : > { %v992_v24 = vld [vmem:[#allocation4 + $0x20] sm:$0xff]  ;;  %v1017_v34 = vadd.f32 %v1276_v19, %v994_v29  ;;  %v1002_v53 = vld [vmem:[#allocation4 + $0x70] sm:$0xff]  ;;  %1056 = vst [vmem:[#allocation3 + $0x8] sm:$0xff] %v1044_v49  ;;  %v1047_v3 = vpack.c.bf16 %v1036_v60, %v1035_v56  ;;  %1072 = vst [vmem:[%s1835_s6 + $0x48] sm:$0xff] %v1036_v60 }
 0x31d   : > { %v1015_v28 = vadd.f32 %v1276_v19, %v992_v24  ;;  %v995_v30 = vld [vmem:[#allocation4 + $0x38] sm:$0xff]  ;;  %v1000_v43 = vld [vmem:[#allocation4 + $0x60] sm:$0xff]  ;;  %1055 = vst [vmem:[#allocation3] sm:$0xff] %v1043_v44  ;;  %v1025_v1 = vadd.f32 %v1276_v19, %v1002_v53  ;;  %1074 = vst [vmem:[%s1835_s6 + $0x58] sm:$0xff] %v1038_v63 }
 0x31e   : > { %v993_v27 = vld [vmem:[#allocation4 + $0x28] sm:$0xff]  ;;  %v1018_v41 = vadd.f32 %v1276_v19, %v995_v30  ;;  %v1033_v46 = vmax.f32 %v1017_v34, 0.0  ;;  %v1003_v54 = vld [vmem:[#allocation4 + $0x78] sm:$0xff]  ;;  %v1023_v58 = vadd.f32 %v1276_v19, %v1000_v43  ;;  %1059 = vst [vmem:[#allocation3 + $0x20] sm:$0xff] %v1047_v3  ;;  %1060 = vst [vmem:[#allocation3 + $0x28] sm:$0xff] %v1048_v5 }
 0x31f   : > { %v1016_v33 = vadd.f32 %v1276_v19, %v993_v27  ;;  %v1031_v40 = vmax.f32 %v1015_v28, 0.0  ;;  %v1001_v48 = vld [vmem:[#allocation4 + $0x68] sm:$0xff]  ;;  %v1026_v2 = vadd.f32 %v1276_v19, %v1003_v54  ;;  %v1041_v6 = vmax.f32 %v1025_v1, 0.0 }
 0x320   : > { %v1034_v50 = vmax.f32 %v1018_v41, 0.0  ;;  %1069 = vst [vmem:[%s1835_s6 + $0x30] sm:$0xff] %v1033_v46  ;;  %v1024_v62 = vadd.f32 %v1276_v19, %v1001_v48  ;;  %v1039_v0 = vmax.f32 %v1023_v58, 0.0 }
 0x321   : > { %v1032_v45 = vmax.f32 %v1016_v33, 0.0  ;;  %1067 = vst [vmem:[%s1835_s6 + $0x20] sm:$0xff] %v1031_v40  ;;  %v1042_v7 = vmax.f32 %v1026_v2, 0.0  ;;  %1077 = vst [vmem:[%s1835_s6 + $0x70] sm:$0xff] %v1041_v6 }
 0x322   : > { %v1046_v59 = vpack.c.bf16 %v1034_v50, %v1033_v46  ;;  %1070 = vst [vmem:[%s1835_s6 + $0x38] sm:$0xff] %v1034_v50  ;;  %v1040_v4 = vmax.f32 %v1024_v62, 0.0  ;;  %1075 = vst [vmem:[%s1835_s6 + $0x60] sm:$0xff] %v1039_v0 }
 0x323   : > { %v1045_v55 = vpack.c.bf16 %v1032_v45, %v1031_v40  ;;  %1068 = vst [vmem:[%s1835_s6 + $0x28] sm:$0xff] %v1032_v45  ;;  %v1050_v9 = vpack.c.bf16 %v1042_v7, %v1041_v6  ;;  %1078 = vst [vmem:[%s1835_s6 + $0x78] sm:$0xff] %v1042_v7 }
 0x324   : > { %1058 = vst [vmem:[#allocation3 + $0x18] sm:$0xff] %v1046_v59  ;;  %v1049_v8 = vpack.c.bf16 %v1040_v4, %v1039_v0  ;;  %1076 = vst [vmem:[%s1835_s6 + $0x68] sm:$0xff] %v1040_v4 }
 0x325   : > { %1057 = vst [vmem:[#allocation3 + $0x10] sm:$0xff] %v1045_v55  ;;  %1062 = vst [vmem:[#allocation3 + $0x38] sm:$0xff] %v1050_v9 }
 0x326   : > { %1061 = vst [vmem:[#allocation3 + $0x30] sm:$0xff] %v1049_v8 }
 0x327 PF: > { %1082 = sbr.rel (%p1258_p5) target bundleno = 821 (0x335), region = 72  ;;  %v1083_v10 = vld [vmem:[#allocation4] sm:$0xff] (!%p1258_p5)  ;;  %v1084_v12 = vld [vmem:[#allocation4 + $0x8] sm:$0xff] (!%p1258_p5)  ;;  %v1085_v15 = vld [vmem:[#allocation4 + $0x10] sm:$0xff] (!%p1258_p5) }
 0x328   : > { %v1278_v11 = vld [vmem:[%s1834_s5] ss:$0 sm:$0xff] (!%p1258_p5)  ;;  %v1086_v16 = vld [vmem:[#allocation4 + $0x18] sm:$0xff] (!%p1258_p5)  ;;  %v1092_v29 = vld [vmem:[#allocation4 + $0x48] sm:$0xff] (!%p1258_p5) }
 0x329   : > { %v1106_v13 = vadd.f32 (!%p1258_p5), %v1278_v11, %v1083_v10  ;;  %v1107_v14 = vadd.f32 (!%p1258_p5), %v1278_v11, %v1084_v12  ;;  %v1108_v18 = vadd.f32 (!%p1258_p5), %v1278_v11, %v1085_v15  ;;  %v1109_v19 = vadd.f32 (!%p1258_p5), %v1278_v11, %v1086_v16  ;;  %v1091_v28 = vld [vmem:[#allocation4 + $0x40] sm:$0xff] (!%p1258_p5)  ;;  %v1093_v30 = vld [vmem:[#allocation4 + $0x50] sm:$0xff] (!%p1258_p5)  ;;  %v1094_v35 = vld [vmem:[#allocation4 + $0x58] sm:$0xff] (!%p1258_p5) }
 0x32a   : > { %v1089_v22 = vld [vmem:[#allocation4 + $0x30] sm:$0xff] (!%p1258_p5)  ;;  %v1114_v40 = vadd.f32 (!%p1258_p5), %v1278_v11, %v1091_v28  ;;  %v1115_v41 = vadd.f32 (!%p1258_p5), %v1278_v11, %v1092_v29  ;;  %v1116_v45 = vadd.f32 (!%p1258_p5), %v1278_v11, %v1093_v30  ;;  %v1117_v46 = vadd.f32 (!%p1258_p5), %v1278_v11, %v1094_v35 }
 0x32b   : > { %v1087_v17 = vld [vmem:[#allocation4 + $0x20] sm:$0xff] (!%p1258_p5)  ;;  %v1122_v24 = vmax.f32 (!%p1258_p5), %v1106_v13, 0.0  ;;  %v1123_v25 = vmax.f32 (!%p1258_p5), %v1107_v14, 0.0  ;;  %v1112_v27 = vadd.f32 (!%p1258_p5), %v1278_v11, %v1089_v22  ;;  %v1124_v31 = vmax.f32 (!%p1258_p5), %v1108_v18, 0.0  ;;  %v1097_v42 = vld [vmem:[#allocation4 + $0x70] sm:$0xff] (!%p1258_p5) }
 0x32c   : > { %v1110_v20 = vadd.f32 (!%p1258_p5), %v1278_v11, %v1087_v17  ;;  %v1090_v23 = vld [vmem:[#allocation4 + $0x38] sm:$0xff] (!%p1258_p5)  ;;  %v1125_v32 = vmax.f32 (!%p1258_p5), %v1109_v19, 0.0  ;;  %v1095_v36 = vld [vmem:[#allocation4 + $0x60] sm:$0xff] (!%p1258_p5)  ;;  %v1130_v48 = vmax.f32 (!%p1258_p5), %v1114_v40, 0.0  ;;  %v1131_v49 = vmax.f32 (!%p1258_p5), %v1115_v41, 0.0 }
 0x32d   : > { %v1088_v21 = vld [vmem:[#allocation4 + $0x28] sm:$0xff] (!%p1258_p5)  ;;  %v1113_v34 = vadd.f32 (!%p1258_p5), %v1278_v11, %v1090_v23  ;;  %1138 = vst [vmem:[%s1835_s6] sm:$0xff] (!%p1258_p5), %v1122_v24  ;;  %1139 = vst [vmem:[%s1835_s6 + $0x8] sm:$0xff] (!%p1258_p5), %v1123_v25  ;;  %v1128_v39 = vmax.f32 (!%p1258_p5), %v1112_v27, 0.0  ;;  %v1098_v43 = vld [vmem:[#allocation4 + $0x78] sm:$0xff] (!%p1258_p5)  ;;  %v1118_v47 = vadd.f32 (!%p1258_p5), %v1278_v11, %v1095_v36  ;;  %v1120_v51 = vadd.f32 (!%p1258_p5), %v1278_v11, %v1097_v42 }
 0x32e   : > { %v1111_v26 = vadd.f32 %v1278_v11, %v1088_v21  ;;  %v1126_v33 = vmax.f32 %v1110_v20, 0.0  ;;  %v1096_v37 = vld [vmem:[#allocation4 + $0x68] sm:$0xff]  ;;  %1140 = vst [vmem:[%s1835_s6 + $0x10] sm:$0xff] %v1124_v31  ;;  %1141 = vst [vmem:[%s1835_s6 + $0x18] sm:$0xff] %v1125_v32  ;;  %v1132_v52 = vmax.f32 %v1116_v45, 0.0  ;;  %v1133_v53 = vmax.f32 %v1117_v46, 0.0 }
 0x32f   : > { %v1129_v44 = vmax.f32 %v1113_v34, 0.0  ;;  %1144 = vst [vmem:[%s1835_s6 + $0x30] sm:$0xff] %v1128_v39  ;;  %v1119_v50 = vadd.f32 %v1278_v11, %v1096_v37  ;;  %v1134_v54 = vmax.f32 %v1118_v47, 0.0  ;;  %v1121_v55 = vadd.f32 %v1278_v11, %v1098_v43  ;;  %1146 = vst [vmem:[%s1835_s6 + $0x40] sm:$0xff] %v1130_v48 }
 0x330   : > { %v1127_v38 = vmax.f32 %v1111_v26, 0.0  ;;  %1142 = vst [vmem:[%s1835_s6 + $0x20] sm:$0xff] %v1126_v33  ;;  %1147 = vst [vmem:[%s1835_s6 + $0x48] sm:$0xff] %v1131_v49  ;;  %v1136_v57 = vmax.f32 %v1120_v51, 0.0 }
 0x331   : > { %1145 = vst [vmem:[%s1835_s6 + $0x38] sm:$0xff] %v1129_v44  ;;  %v1135_v56 = vmax.f32 %v1119_v50, 0.0  ;;  %1148 = vst [vmem:[%s1835_s6 + $0x50] sm:$0xff] %v1132_v52  ;;  %v1137_v58 = vmax.f32 %v1121_v55, 0.0 }
 0x332   : > { %1143 = vst [vmem:[%s1835_s6 + $0x28] sm:$0xff] %v1127_v38  ;;  %1149 = vst [vmem:[%s1835_s6 + $0x58] sm:$0xff] %v1133_v53 }
 0x333   : > { %1150 = vst [vmem:[%s1835_s6 + $0x60] sm:$0xff] %v1134_v54  ;;  %1151 = vst [vmem:[%s1835_s6 + $0x68] sm:$0xff] %v1135_v56 }
 0x334   : > { %1152 = vst [vmem:[%s1835_s6 + $0x70] sm:$0xff] %v1136_v57  ;;  %1153 = vst [vmem:[%s1835_s6 + $0x78] sm:$0xff] %v1137_v58 }
 0x335 PF: > { %s16_s23 = sadd.s32 1, %s1554_s23   ;;  %s1836_s21 = smov %s1550_s22 }
 0x336   : > { %p13_p6 = scmp.ge.s32.totalorder %s16_s23, 4   ;;  %s1837_s22 = smov %s1839_s24 }
 0x338   :  { %15 = sbr.rel (!%p13_p6) target bundleno = 2 (0x2), region = 108 }

</bundles_post_ra>
